<compile_context>
chip_gen: v7x
topology: tpu7x:2x2x1
jax: 0.10.0
libtpu: 0.0.40
codegen_flags: <defaults>
</compile_context>

<pallas_src>
import functools

import jax
import jax.numpy as jnp
from jax.experimental import pallas as pl
from jax.experimental.pallas import tpu as pltpu


def _round_up(x, m):
    return ((x + m - 1) // m) * m


def _leaky_relu(x, slope=0.2):
    return jnp.where(x > 0, x, slope * x)


def mdn_fc_kernel(h_ref,
                  w1_ref, b1_ref,
                  w2_ref, b2_ref,
                  w3_ref, b3_ref,
                  wh_ref, bh_ref,
                  out_ref,
                  *, n_mixture, n_mo):
    """One batch tile: trunk + fused (pi|mu|sigma) head, lane-dense output."""
    cdt = w1_ref.dtype                      # bf16 MXU operand dtype
    h = h_ref[...].astype(cdt)

    # trunk: 3 x (Linear -> Dropout(identity) -> LeakyReLU(0.2)); f32 accum
    h = _leaky_relu(jnp.dot(h, w1_ref[...],
                            preferred_element_type=jnp.float32) + b1_ref[...])
    h = _leaky_relu(jnp.dot(h.astype(cdt), w2_ref[...],
                            preferred_element_type=jnp.float32) + b2_ref[...])
    h = _leaky_relu(jnp.dot(h.astype(cdt), w3_ref[...],
                            preferred_element_type=jnp.float32) + b3_ref[...])

    # fused heads: one lane-dense matmul, one 128-wide bias add
    z = jnp.dot(h.astype(cdt), wh_ref[...],
                preferred_element_type=jnp.float32) + bh_ref[...]

    head_pad = z.shape[-1]
    col = jax.lax.broadcasted_iota(jnp.int32, (1, head_pad), 1)
    pi_mask = col < n_mixture
    sig_mask = (col >= n_mixture + n_mo) & (col < n_mixture + 2 * n_mo)

    # pi: masked softmax over the mixture columns
    logits = jnp.where(pi_mask, z, -jnp.inf)
    m = jnp.max(logits, axis=-1, keepdims=True)
    e = jnp.exp(logits - m)                 # exp(-inf) = 0 on non-pi lanes
    denom = jnp.sum(e, axis=-1, keepdims=True)
    pi_vals = e * pl.reciprocal(denom, approx=True)

    # sigma: softplus (stable) + clamp at 0.001
    sig_vals = jnp.maximum(jnp.logaddexp(z, 0.0), 0.001)

    # mu (and padded columns): raw linear output
    out_ref[...] = jnp.where(pi_mask, pi_vals,
                             jnp.where(sig_mask, sig_vals, z))


def v_network_mdn_fc_forward(h, params, n_mixture, n_outputs):
    """h: [bsize, hidden_size] float32.  Returns (pi, mu, sigma)."""
    (w1, b1, w2, b2, w3, b3, wpi, bpi, wmu, bmu, wsig, bsig) = params
    bsize, hidden_size = h.shape
    nfeature = w1.shape[1]
    n_mo = n_mixture * n_outputs
    head = n_mixture + 2 * n_mo

    LANE = 128
    H_PAD = _round_up(hidden_size, LANE)
    F_PAD = _round_up(nfeature, LANE)
    HEAD_PAD = _round_up(head, LANE)

    wdt = jnp.bfloat16                      # MXU operand dtype (f32 accumulate)

    def pad_w(w, rows, cols):
        return jnp.pad(w, ((0, rows - w.shape[0]),
                           (0, cols - w.shape[1]))).astype(wdt)

    def pad_b(b, cols):
        b = b.reshape(1, -1)
        return jnp.pad(b, ((0, 0), (0, cols - b.shape[1]))).astype(jnp.float32)

    w1p, b1p = pad_w(w1, H_PAD, F_PAD), pad_b(b1, F_PAD)
    w2p, b2p = pad_w(w2, F_PAD, F_PAD), pad_b(b2, F_PAD)
    w3p, b3p = pad_w(w3, F_PAD, F_PAD), pad_b(b3, F_PAD)
    # fuse the three heads along the output axis (pi | mu | sigma), then pad
    wh = jnp.concatenate([wpi, wmu, wsig], axis=1)
    bh = jnp.concatenate([bpi.reshape(1, -1), bmu.reshape(1, -1),
                          bsig.reshape(1, -1)], axis=1)
    whp, bhp = pad_w(wh, F_PAD, HEAD_PAD), pad_b(bh, HEAD_PAD)

    # batch tiling: small batches pad to one sublane group (8); large batches
    # use 256-row tiles (amortizes per-step overhead, fits v7x 64 MiB VMEM
    # with double-buffered h/out tiles + resident bf16 weights).
    TM = min(256, _round_up(max(bsize, 1), 8))
    B_pad = _round_up(bsize, TM)
    h_p = jnp.pad(h.astype(jnp.float32),
                  ((0, B_pad - bsize), (0, H_PAD - hidden_size)))

    grid = (B_pad // TM,)

    w_spec_hf = pl.BlockSpec((H_PAD, F_PAD), lambda i: (0, 0))
    w_spec_ff = pl.BlockSpec((F_PAD, F_PAD), lambda i: (0, 0))
    w_spec_fh = pl.BlockSpec((F_PAD, HEAD_PAD), lambda i: (0, 0))
    b_spec_f = pl.BlockSpec((1, F_PAD), lambda i: (0, 0))
    b_spec_h = pl.BlockSpec((1, HEAD_PAD), lambda i: (0, 0))

    out = pl.pallas_call(
        functools.partial(mdn_fc_kernel, n_mixture=n_mixture, n_mo=n_mo),
        out_shape=jax.ShapeDtypeStruct((B_pad, HEAD_PAD), jnp.float32),
        grid=grid,
        in_specs=[
            pl.BlockSpec((TM, H_PAD), lambda i: (i, 0)),   # h (batch-tiled)
            w_spec_hf, b_spec_f,                           # layer 1
            w_spec_ff, b_spec_f,                           # layer 2
            w_spec_ff, b_spec_f,                           # layer 3
            w_spec_fh, b_spec_h,                           # fused heads
        ],
        out_specs=pl.BlockSpec((TM, HEAD_PAD), lambda i: (i, 0)),
        compiler_params=pltpu.CompilerParams(
            dimension_semantics=("parallel",)),
    )(h_p, w1p, b1p, w2p, b2p, w3p, b3p, whp, bhp)

    pi = out[:bsize, :n_mixture]
    mu = out[:bsize, n_mixture:n_mixture + n_mo] \
        .reshape(bsize, n_mixture, n_outputs)
    sigma = out[:bsize, n_mixture + n_mo:n_mixture + 2 * n_mo] \
        .reshape(bsize, n_mixture, n_outputs)
    return pi, mu, sigma


def init_params(key, hidden_size, nfeature, n_mixture, n_outputs):
    """Deterministic parameter init.  Linear weights stored (in, out)."""
    def linear(key, fan_in, fan_out):
        kw, kb = jax.random.split(key)
        bound = 1.0 / jnp.sqrt(fan_in)
        w = jax.random.uniform(kw, (fan_in, fan_out), jnp.float32, -bound, bound)
        b = jax.random.uniform(kb, (1, fan_out), jnp.float32, -bound, bound)
        return w, b

    keys = jax.random.split(key, 6)
    w1, b1 = linear(keys[0], hidden_size, nfeature)
    w2, b2 = linear(keys[1], nfeature, nfeature)
    w3, b3 = linear(keys[2], nfeature, nfeature)
    wpi, bpi = linear(keys[3], nfeature, n_mixture)
    wmu, bmu = linear(keys[4], nfeature, n_mixture * n_outputs)
    wsig, bsig = linear(keys[5], nfeature, n_mixture * n_outputs)
    return (w1, b1, w2, b2, w3, b3, wpi, bpi, wmu, bmu, wsig, bsig)


def reference_forward(h, params, n_mixture, n_outputs):
    """Pure-JAX reference (matches kernel's bf16 matmul operands)."""
    (w1, b1, w2, b2, w3, b3, wpi, bpi, wmu, bmu, wsig, bsig) = params

    def lin(x, w, b):
        xb = x.astype(jnp.bfloat16).astype(jnp.float32)
        wb = w.astype(jnp.bfloat16).astype(jnp.float32)
        return xb @ wb + b.reshape(1, -1)

    x = jax.nn.leaky_relu(lin(h, w1, b1), 0.2)
    x = jax.nn.leaky_relu(lin(x, w2, b2), 0.2)
    x = jax.nn.leaky_relu(lin(x, w3, b3), 0.2)
    pi = jax.nn.softmax(lin(x, wpi, bpi), axis=1)
    mu = lin(x, wmu, bmu).reshape(-1, n_mixture, n_outputs)
    sigma = jnp.maximum(jax.nn.softplus(lin(x, wsig, bsig)), 0.001) \
        .reshape(-1, n_mixture, n_outputs)
    return pi, mu, sigma


if __name__ == "__main__":
    # small shapes consistent with the module
    bsize = 2
    hidden_size = 32
    nfeature = 64
    n_mixture = 8
    n_outputs = 4

    key = jax.random.PRNGKey(0)
    k_h, k_p = jax.random.split(key)

    h = jax.random.normal(k_h, (bsize, hidden_size), jnp.float32)
    params = init_params(k_p, hidden_size, nfeature, n_mixture, n_outputs)

    pi, mu, sigma = v_network_mdn_fc_forward(h, params, n_mixture, n_outputs)
    jax.block_until_ready((pi, mu, sigma))

    # structural checks
    assert pi.shape == (bsize, n_mixture)
    assert mu.shape == (bsize, n_mixture, n_outputs)
    assert sigma.shape == (bsize, n_mixture, n_outputs)
    assert bool(jnp.all(jnp.isfinite(pi)))
    assert bool(jnp.all(jnp.isfinite(mu)))
    assert bool(jnp.all(jnp.isfinite(sigma)))
    assert bool(jnp.allclose(jnp.sum(pi, axis=1), 1.0, atol=1e-2))
    assert bool(jnp.all(sigma >= 0.001))

    # numerical check vs. pure-JAX reference (loose: bf16 operands + approx
    # reciprocal in the softmax denominator)
    pi_r, mu_r, sigma_r = reference_forward(h, params, n_mixture, n_outputs)
    assert bool(jnp.allclose(pi, pi_r, rtol=1e-2, atol=1e-2))
    assert bool(jnp.allclose(mu, mu_r, rtol=1e-2, atol=1e-2))
    assert bool(jnp.allclose(sigma, sigma_r, rtol=1e-2, atol=1e-2))

    print("KERNEL_OK")
</pallas_src>

<mosaic_0001>
module attributes {stable_mosaic.version = 11 : i64} {
  func.func @mdn_fc_kernel(%arg0: i32, %arg1: memref<8x128xf32, #tpu.memory_space<vmem>>, %arg2: memref<128x128xbf16, #tpu.memory_space<vmem>>, %arg3: memref<1x128xf32, #tpu.memory_space<vmem>>, %arg4: memref<128x128xbf16, #tpu.memory_space<vmem>>, %arg5: memref<1x128xf32, #tpu.memory_space<vmem>>, %arg6: memref<128x128xbf16, #tpu.memory_space<vmem>>, %arg7: memref<1x128xf32, #tpu.memory_space<vmem>>, %arg8: memref<128x128xbf16, #tpu.memory_space<vmem>>, %arg9: memref<1x128xf32, #tpu.memory_space<vmem>>, %arg10: memref<8x128xf32, #tpu.memory_space<vmem>>) attributes {dimension_semantics = [#tpu.dimension_semantics<parallel>], iteration_bounds = array<i64: 1>, scalar_prefetch = 0 : i64, scratch_operands = 0 : i64, tpu.core_type = #tpu.core_type<tc>, window_params = [{transform_indices = @transform_0, window_bounds = array<i64: 8, 128>}, {pipeline_mode = #tpu.pipeline_mode<synchronous>, transform_indices = @transform_1, window_bounds = array<i64: 128, 128>}, {pipeline_mode = #tpu.pipeline_mode<synchronous>, transform_indices = @transform_2, window_bounds = array<i64: 1, 128>}, {pipeline_mode = #tpu.pipeline_mode<synchronous>, transform_indices = @transform_3, window_bounds = array<i64: 128, 128>}, {pipeline_mode = #tpu.pipeline_mode<synchronous>, transform_indices = @transform_4, window_bounds = array<i64: 1, 128>}, {pipeline_mode = #tpu.pipeline_mode<synchronous>, transform_indices = @transform_5, window_bounds = array<i64: 128, 128>}, {pipeline_mode = #tpu.pipeline_mode<synchronous>, transform_indices = @transform_6, window_bounds = array<i64: 1, 128>}, {pipeline_mode = #tpu.pipeline_mode<synchronous>, transform_indices = @transform_7, window_bounds = array<i64: 128, 128>}, {pipeline_mode = #tpu.pipeline_mode<synchronous>, transform_indices = @transform_8, window_bounds = array<i64: 1, 128>}, {transform_indices = @transform_9, window_bounds = array<i64: 8, 128>}]} {
    %c0 = arith.constant 0 : index
    %c0_0 = arith.constant 0 : index
    %0 = vector.load %arg1[%c0, %c0_0] : memref<8x128xf32, #tpu.memory_space<vmem>>, vector<8x128xf32>
    %1 = arith.truncf %0 : vector<8x128xf32> to vector<8x128xbf16>
    %c0_1 = arith.constant 0 : index
    %c0_2 = arith.constant 0 : index
    %2 = vector.load %arg2[%c0_1, %c0_2] : memref<128x128xbf16, #tpu.memory_space<vmem>>, vector<128x128xbf16>
    %cst = arith.constant dense<0.000000e+00> : vector<8x128xf32>
    %3 = tpu.matmul %1, %2, %cst {dimension_numbers = #tpu.dot_dimension_numbers<[1], [0], [0], [1], [0, 0, 1, 1], [], []>} : vector<8x128xbf16>, vector<128x128xbf16>, vector<8x128xf32> -> vector<8x128xf32>
    %c0_3 = arith.constant 0 : index
    %c0_4 = arith.constant 0 : index
    %4 = vector.load %arg3[%c0_3, %c0_4] : memref<1x128xf32, #tpu.memory_space<vmem>>, vector<1x128xf32>
    %5 = vector.broadcast %4 : vector<1x128xf32> to vector<8x128xf32>
    %6 = arith.addf %3, %5 : vector<8x128xf32>
    %cst_5 = arith.constant 0.000000e+00 : f32
    %7 = vector.broadcast %cst_5 : f32 to vector<8x128xf32>
    %8 = arith.cmpf ogt, %6, %7 : vector<8x128xf32>
    %cst_6 = arith.constant 2.000000e-01 : f32
    %9 = vector.broadcast %cst_6 : f32 to vector<8x128xf32>
    %10 = arith.mulf %9, %6 : vector<8x128xf32>
    %11 = arith.select %8, %6, %10 : vector<8x128xi1>, vector<8x128xf32>
    %12 = arith.truncf %11 : vector<8x128xf32> to vector<8x128xbf16>
    %c0_7 = arith.constant 0 : index
    %c0_8 = arith.constant 0 : index
    %13 = vector.load %arg4[%c0_7, %c0_8] : memref<128x128xbf16, #tpu.memory_space<vmem>>, vector<128x128xbf16>
    %cst_9 = arith.constant dense<0.000000e+00> : vector<8x128xf32>
    %14 = tpu.matmul %12, %13, %cst_9 {dimension_numbers = #tpu.dot_dimension_numbers<[1], [0], [0], [1], [0, 0, 1, 1], [], []>} : vector<8x128xbf16>, vector<128x128xbf16>, vector<8x128xf32> -> vector<8x128xf32>
    %c0_10 = arith.constant 0 : index
    %c0_11 = arith.constant 0 : index
    %15 = vector.load %arg5[%c0_10, %c0_11] : memref<1x128xf32, #tpu.memory_space<vmem>>, vector<1x128xf32>
    %16 = vector.broadcast %15 : vector<1x128xf32> to vector<8x128xf32>
    %17 = arith.addf %14, %16 : vector<8x128xf32>
    %cst_12 = arith.constant 0.000000e+00 : f32
    %18 = vector.broadcast %cst_12 : f32 to vector<8x128xf32>
    %19 = arith.cmpf ogt, %17, %18 : vector<8x128xf32>
    %cst_13 = arith.constant 2.000000e-01 : f32
    %20 = vector.broadcast %cst_13 : f32 to vector<8x128xf32>
    %21 = arith.mulf %20, %17 : vector<8x128xf32>
    %22 = arith.select %19, %17, %21 : vector<8x128xi1>, vector<8x128xf32>
    %23 = arith.truncf %22 : vector<8x128xf32> to vector<8x128xbf16>
    %c0_14 = arith.constant 0 : index
    %c0_15 = arith.constant 0 : index
    %24 = vector.load %arg6[%c0_14, %c0_15] : memref<128x128xbf16, #tpu.memory_space<vmem>>, vector<128x128xbf16>
    %cst_16 = arith.constant dense<0.000000e+00> : vector<8x128xf32>
    %25 = tpu.matmul %23, %24, %cst_16 {dimension_numbers = #tpu.dot_dimension_numbers<[1], [0], [0], [1], [0, 0, 1, 1], [], []>} : vector<8x128xbf16>, vector<128x128xbf16>, vector<8x128xf32> -> vector<8x128xf32>
    %c0_17 = arith.constant 0 : index
    %c0_18 = arith.constant 0 : index
    %26 = vector.load %arg7[%c0_17, %c0_18] : memref<1x128xf32, #tpu.memory_space<vmem>>, vector<1x128xf32>
    %27 = vector.broadcast %26 : vector<1x128xf32> to vector<8x128xf32>
    %28 = arith.addf %25, %27 : vector<8x128xf32>
    %cst_19 = arith.constant 0.000000e+00 : f32
    %29 = vector.broadcast %cst_19 : f32 to vector<8x128xf32>
    %30 = arith.cmpf ogt, %28, %29 : vector<8x128xf32>
    %cst_20 = arith.constant 2.000000e-01 : f32
    %31 = vector.broadcast %cst_20 : f32 to vector<8x128xf32>
    %32 = arith.mulf %31, %28 : vector<8x128xf32>
    %33 = arith.select %30, %28, %32 : vector<8x128xi1>, vector<8x128xf32>
    %34 = arith.truncf %33 : vector<8x128xf32> to vector<8x128xbf16>
    %c0_21 = arith.constant 0 : index
    %c0_22 = arith.constant 0 : index
    %35 = vector.load %arg8[%c0_21, %c0_22] : memref<128x128xbf16, #tpu.memory_space<vmem>>, vector<128x128xbf16>
    %cst_23 = arith.constant dense<0.000000e+00> : vector<8x128xf32>
    %36 = tpu.matmul %34, %35, %cst_23 {dimension_numbers = #tpu.dot_dimension_numbers<[1], [0], [0], [1], [0, 0, 1, 1], [], []>} : vector<8x128xbf16>, vector<128x128xbf16>, vector<8x128xf32> -> vector<8x128xf32>
    %c0_24 = arith.constant 0 : index
    %c0_25 = arith.constant 0 : index
    %37 = vector.load %arg9[%c0_24, %c0_25] : memref<1x128xf32, #tpu.memory_space<vmem>>, vector<1x128xf32>
    %38 = vector.broadcast %37 : vector<1x128xf32> to vector<8x128xf32>
    %39 = arith.addf %36, %38 : vector<8x128xf32>
    %40 = tpu.iota {dimensions = array<i32: 1>} : vector<1x128xi32>
    %c8_i32 = arith.constant 8 : i32
    %41 = vector.broadcast %c8_i32 : i32 to vector<1x128xi32>
    %42 = arith.cmpi slt, %40, %41 : vector<1x128xi32>
    %c40_i32 = arith.constant 40 : i32
    %43 = vector.broadcast %c40_i32 : i32 to vector<1x128xi32>
    %44 = arith.cmpi sge, %40, %43 : vector<1x128xi32>
    %c72_i32 = arith.constant 72 : i32
    %45 = vector.broadcast %c72_i32 : i32 to vector<1x128xi32>
    %46 = arith.cmpi slt, %40, %45 : vector<1x128xi32>
    %47 = arith.andi %44, %46 : vector<1x128xi1>
    %cst_26 = arith.constant 0xFF800000 : f32
    %48 = vector.shape_cast %42 : vector<1x128xi1> to vector<1x128xi1>
    %49 = vector.broadcast %48 : vector<1x128xi1> to vector<8x128xi1>
    %50 = vector.broadcast %cst_26 : f32 to vector<8x128xf32>
    %51 = arith.select %49, %39, %50 : vector<8x128xi1>, vector<8x128xf32>
    %cst_27 = arith.constant dense<0xFF800000> : vector<8xf32>
    %52 = vector.multi_reduction <maximumf>, %51, %cst_27 [1] : vector<8x128xf32> to vector<8xf32>
    %53 = vector.shape_cast %52 : vector<8xf32> to vector<8x1xf32>
    %54 = vector.broadcast %53 : vector<8x1xf32> to vector<8x128xf32>
    %55 = arith.subf %51, %54 : vector<8x128xf32>
    %56 = math.exp %55 : vector<8x128xf32>
    %cst_28 = arith.constant dense<0.000000e+00> : vector<8xf32>
    %57 = vector.multi_reduction <add>, %56, %cst_28 [1] : vector<8x128xf32> to vector<8xf32>
    %58 = vector.shape_cast %57 : vector<8xf32> to vector<8x1xf32>
    %59 = tpu.reciprocal %58 {approx = true} : vector<8x1xf32> -> vector<8x1xf32>
    %60 = vector.broadcast %59 : vector<8x1xf32> to vector<8x128xf32>
    %61 = arith.mulf %56, %60 : vector<8x128xf32>
    %cst_29 = arith.constant 0.000000e+00 : f32
    %62 = vector.broadcast %cst_29 : f32 to vector<8x128xf32>
    %63 = arith.maximumf %39, %62 : vector<8x128xf32>
    %64 = vector.broadcast %cst_29 : f32 to vector<8x128xf32>
    %65 = arith.subf %39, %64 : vector<8x128xf32>
    %66 = arith.cmpf one, %65, %65 : vector<8x128xf32>
    %67 = vector.broadcast %cst_29 : f32 to vector<8x128xf32>
    %68 = arith.addf %39, %67 : vector<8x128xf32>
    %69 = math.absf %65 : vector<8x128xf32>
    %cst_30 = arith.constant 0.000000e+00 : f32
    %70 = vector.broadcast %cst_30 : f32 to vector<8x128xf32>
    %71 = arith.subf %70, %69 : vector<8x128xf32>
    %72 = math.exp %71 : vector<8x128xf32>
    %73 = math.log1p %72 : vector<8x128xf32>
    %74 = arith.addf %63, %73 : vector<8x128xf32>
    %75 = arith.select %66, %68, %74 : vector<8x128xi1>, vector<8x128xf32>
    %cst_31 = arith.constant 1.000000e-03 : f32
    %76 = vector.broadcast %cst_31 : f32 to vector<8x128xf32>
    %77 = arith.maximumf %75, %76 : vector<8x128xf32>
    %78 = vector.shape_cast %47 : vector<1x128xi1> to vector<1x128xi1>
    %79 = vector.broadcast %78 : vector<1x128xi1> to vector<8x128xi1>
    %80 = arith.select %79, %77, %39 : vector<8x128xi1>, vector<8x128xf32>
    %81 = vector.shape_cast %42 : vector<1x128xi1> to vector<1x128xi1>
    %82 = vector.broadcast %81 : vector<1x128xi1> to vector<8x128xi1>
    %83 = arith.select %82, %61, %80 : vector<8x128xi1>, vector<8x128xf32>
    %c0_32 = arith.constant 0 : index
    %c0_33 = arith.constant 0 : index
    %84 = vector.load %arg10[%c0_32, %c0_33] : memref<8x128xf32, #tpu.memory_space<vmem>>, vector<8x128xf32>
    tpu.vector_store %arg10[%c0_32, %c0_33], %83 {strides = array<i32>} : memref<8x128xf32, #tpu.memory_space<vmem>>, vector<8x128xf32>,
    return
  }
  func.func @transform_0(%arg0: i32) -> (i32, i32) {
    %c0_i32 = arith.constant 0 : i32
    %c0_i32_0 = arith.constant 0 : i32
    return %arg0, %c0_i32 : i32, i32
  }
  func.func @transform_1(%arg0: i32) -> (i32, i32) {
    %c0_i32 = arith.constant 0 : i32
    %c0_i32_0 = arith.constant 0 : i32
    %c0_i32_1 = arith.constant 0 : i32
    return %c0_i32, %c0_i32_0 : i32, i32
  }
  func.func @transform_2(%arg0: i32) -> (i32, i32) {
    %c0_i32 = arith.constant 0 : i32
    %c0_i32_0 = arith.constant 0 : i32
    %c0_i32_1 = arith.constant 0 : i32
    return %c0_i32, %c0_i32_0 : i32, i32
  }
  func.func @transform_3(%arg0: i32) -> (i32, i32) {
    %c0_i32 = arith.constant 0 : i32
    %c0_i32_0 = arith.constant 0 : i32
    %c0_i32_1 = arith.constant 0 : i32
    return %c0_i32, %c0_i32_0 : i32, i32
  }
  func.func @transform_4(%arg0: i32) -> (i32, i32) {
    %c0_i32 = arith.constant 0 : i32
    %c0_i32_0 = arith.constant 0 : i32
    %c0_i32_1 = arith.constant 0 : i32
    return %c0_i32, %c0_i32_0 : i32, i32
  }
  func.func @transform_5(%arg0: i32) -> (i32, i32) {
    %c0_i32 = arith.constant 0 : i32
    %c0_i32_0 = arith.constant 0 : i32
    %c0_i32_1 = arith.constant 0 : i32
    return %c0_i32, %c0_i32_0 : i32, i32
  }
  func.func @transform_6(%arg0: i32) -> (i32, i32) {
    %c0_i32 = arith.constant 0 : i32
    %c0_i32_0 = arith.constant 0 : i32
    %c0_i32_1 = arith.constant 0 : i32
    return %c0_i32, %c0_i32_0 : i32, i32
  }
  func.func @transform_7(%arg0: i32) -> (i32, i32) {
    %c0_i32 = arith.constant 0 : i32
    %c0_i32_0 = arith.constant 0 : i32
    %c0_i32_1 = arith.constant 0 : i32
    return %c0_i32, %c0_i32_0 : i32, i32
  }
  func.func @transform_8(%arg0: i32) -> (i32, i32) {
    %c0_i32 = arith.constant 0 : i32
    %c0_i32_0 = arith.constant 0 : i32
    %c0_i32_1 = arith.constant 0 : i32
    return %c0_i32, %c0_i32_0 : i32, i32
  }
  func.func @transform_9(%arg0: i32) -> (i32, i32) {
    %c0_i32 = arith.constant 0 : i32
    %c0_i32_0 = arith.constant 0 : i32
    return %arg0, %c0_i32 : i32, i32
  }
}

</mosaic_0001>

<bundles_post_ra>
// kernel: tpu_custom_call.1
= control target key start
LH: loop header
LB: loop body
LE: loop exit
PB: predicated region body
PF: predicated region fallthrough
CT: control target
= control target key end

     0   :  { %14 = vsyncpa [#allocation3], 0  ;;  %s1157_s0 = inlined_call_operand.hbm [shape: f32[8,128], index: 0, kind: input, shape index: {}]   ;;  %s1158_s1 = inlined_call_operand.hbm [shape: bf16[128,128], index: 1, kind: input, shape index: {}]   ;;  %s1159_s2 = inlined_call_operand.vmem [shape: f32[1,128], index: 2, kind: input, shape index: {}]   ;;  %s1160_s3 = inlined_call_operand.hbm [shape: bf16[128,128], index: 3, kind: input, shape index: {}]   ;;  %s1161_s4 = inlined_call_operand.vmem [shape: f32[1,128], index: 4, kind: input, shape index: {}]   ;;  %s1162_s5 = inlined_call_operand.hbm [shape: bf16[128,128], index: 5, kind: input, shape index: {}]   ;;  %s1163_s6 = inlined_call_operand.vmem [shape: f32[1,128], index: 6, kind: input, shape index: {}]   ;;  %s1164_s7 = inlined_call_operand.hbm [shape: bf16[128,128], index: 7, kind: input, shape index: {}]   ;;  %s1165_s8 = inlined_call_operand.vmem [shape: f32[1,128], index: 8, kind: input, shape index: {}]   ;;  %s1166_s9 = inlined_call_operand.hbm [shape: f32[8,128], index: 9, kind: output, shape index: {}]  }
   0x1   :  { %15 = vsyncpa [#allocation6], 0 }
   0x2   :  { %16 = vsyncpa [#allocation9], 0 }
   0x3   :  { %17 = vsyncpa [#allocation4], 0  ;;  %s959_s30 = smov [#allocation5]   ;;  %s819_s13 = scalar_lea.hbm %s1158_s1, 1024 }
   0x4   :  { %s33_s10 = sshll.u32 %s959_s30, 4  ;;  %p820_p0 = scmp.ne.s32.totalorder %s1158_s1, %s819_s13  ;;  %s34_s10 = int_to_ptr.vmem [resolvable:$true] %s33_s10 }
   0x5   :  { %p823_p1 = scmp.lt.u32.totalorder %s819_s13, %s1158_s1 }
   0x7   :  { %p825_p2 = pnand %p823_p1, %p820_p0 }
   0x9   :  { %828 = shalt.err (!%p825_p2)
}
   0xa   :  { %s829_s18 = scalar_lea.vmem %s34_s10, 1024  ;;  %p834_p4 = scmp.lt.s32.totalorder %s34_s10, %s34_s10 }
   0xb   :  { %p830_p3 = scmp.ne.s32.totalorder %s34_s10, %s829_s18  ;;  %p835_p5 = scmp.lt.s32.totalorder %s829_s18, %s829_s18 }
   0xd   :  { %p836_p6 = por %p835_p5, %p834_p4 }
   0xf   :  { %p837_p7 = pnand %p836_p6, %p830_p3 }
  0x11   :  { %840 = shalt.err (!%p837_p7)
}
  0x12   :  { %s960_s19 = smov 64   ;;  %s961_s20 = smov 4  }
  0x13   :  { %39 = dma.hbm_to_vmem [thread:$0]  %s1158_s1, 1024, %s34_s10, [#allocation6], %s960_s19, %s960_s19, %s961_s20  }
  0x14   :  { %s962_s23 = smov [#allocation8]   ;;  %s963_s25 = smov [#allocation2]  }
  0x15   :  { %s61_s24 = sshll.u32 %s962_s23, 4  ;;  %s24_s26 = sshll.u32 %s963_s25, 4  ;;  %s62_s24 = int_to_ptr.vmem [resolvable:$true] %s61_s24  ;;  %s25_s26 = int_to_ptr.vmem [resolvable:$true] %s24_s26 }
  0x16   :  { %s841_s29 = scalar_lea.hbm %s1162_s5, 1024 }
  0x17   :  { %p842_p8 = scmp.ne.s32.totalorder %s1162_s5, %s841_s29  ;;  %p845_p9 = scmp.lt.u32.totalorder %s841_s29, %s1162_s5 }
  0x19   :  { %p847_p10 = pnand %p845_p9, %p842_p8 }
  0x1b   :  { %850 = shalt.err (!%p847_p10)
}
  0x1c   :  { %s851_s1 = scalar_lea.vmem %s62_s24, 1024  ;;  %p856_p12 = scmp.lt.s32.totalorder %s62_s24, %s62_s24 }
  0x1d   :  { %p852_p11 = scmp.ne.s32.totalorder %s62_s24, %s851_s1  ;;  %p857_p13 = scmp.lt.s32.totalorder %s851_s1, %s851_s1 }
  0x1f   :  { %p858_p0 = por %p857_p13, %p856_p12 }
  0x21   :  { %p859_p1 = pnand %p858_p0, %p852_p11 }
  0x23   :  { %862 = shalt.err (!%p859_p1)
}
  0x24   :  { %67 = dma.hbm_to_vmem [thread:$0]  %s1162_s5, 1024, %s62_s24, [#allocation9], %s960_s19, %s960_s19, %s961_s20  }
  0x25   :  { %s863_s17 = scalar_lea.hbm %s1157_s0, 128 }
  0x26   :  { %p864_p2 = scmp.ne.s32.totalorder %s1157_s0, %s863_s17  ;;  %p867_p3 = scmp.lt.u32.totalorder %s863_s17, %s1157_s0 }
  0x28   :  { %p869_p4 = pnand %p867_p3, %p864_p2 }
  0x2a   :  { %872 = shalt.err (!%p869_p4)
}
  0x2b   :  { %s873_s25 = scalar_lea.vmem %s25_s26, 128  ;;  %p878_p6 = scmp.lt.s32.totalorder %s25_s26, %s25_s26 }
  0x2c   :  { %p874_p5 = scmp.ne.s32.totalorder %s25_s26, %s873_s25  ;;  %p879_p7 = scmp.lt.s32.totalorder %s873_s25, %s873_s25 }
  0x2e   :  { %p880_p8 = por %p879_p7, %p878_p6 }
  0x30   :  { %p881_p9 = pnand %p880_p8, %p874_p5 }
  0x32   :  { %884 = shalt.err (!%p881_p9)
}
  0x33   :  { %27 = dma.hbm_to_vmem [thread:$0]  %s1157_s0, 128, %s25_s26, [#allocation3]  }
  0x34   :  { %s964_s27 = smov [#allocation7]   ;;  %s965_s29 = smov [#allocation10]  }
  0x35   :  { %s47_s28 = sshll.u32 %s964_s27, 4  ;;  %s75_s30 = sshll.u32 %s965_s29, 4  ;;  %s48_s28 = int_to_ptr.vmem [resolvable:$true] %s47_s28  ;;  %s76_s30 = int_to_ptr.vmem [resolvable:$true] %s75_s30 }
  0x36   :  { %s885_s13 = scalar_lea.hbm %s1160_s3, 1024 }
  0x37   :  { %p886_p10 = scmp.ne.s32.totalorder %s1160_s3, %s885_s13  ;;  %p889_p11 = scmp.lt.u32.totalorder %s885_s13, %s1160_s3 }
  0x39   :  { %p891_p12 = pnand %p889_p11, %p886_p10 }
  0x3b   :  { %894 = shalt.err (!%p891_p12)
}
  0x3c   :  { %s895_s0 = scalar_lea.vmem %s48_s28, 1024  ;;  %p900_p0 = scmp.lt.s32.totalorder %s48_s28, %s48_s28 }
  0x3d   :  { %p896_p13 = scmp.ne.s32.totalorder %s48_s28, %s895_s0  ;;  %p901_p1 = scmp.lt.s32.totalorder %s895_s0, %s895_s0 }
  0x3f   :  { %p902_p2 = por %p901_p1, %p900_p0 }
  0x41   :  { %p903_p3 = pnand %p902_p2, %p896_p13 }
  0x43   :  { %906 = shalt.err (!%p903_p3)
}
  0x44   :  { %53 = dma.hbm_to_vmem [thread:$0]  %s1160_s3, 1024, %s48_s28, [#allocation6], %s960_s19, %s960_s19, %s961_s20  }
  0x45   :  { %s907_s21 = scalar_lea.hbm %s1164_s7, 1024 }
  0x46   :  { %p908_p4 = scmp.ne.s32.totalorder %s1164_s7, %s907_s21  ;;  %p911_p5 = scmp.lt.u32.totalorder %s907_s21, %s1164_s7 }
  0x48   :  { %p913_p6 = pnand %p911_p5, %p908_p4 }
  0x4a   :  { %916 = shalt.err (!%p913_p6)
}
  0x4b   :  { %s917_s24 = scalar_lea.vmem %s76_s30, 1024  ;;  %p922_p8 = scmp.lt.s32.totalorder %s76_s30, %s76_s30 }
  0x4c   :  { %p918_p7 = scmp.ne.s32.totalorder %s76_s30, %s917_s24  ;;  %p923_p9 = scmp.lt.s32.totalorder %s917_s24, %s917_s24 }
  0x4e   :  { %p924_p10 = por %p923_p9, %p922_p8 }
  0x50   :  { %p925_p11 = pnand %p924_p10, %p918_p7 }
  0x52   :  { %928 = shalt.err (!%p925_p11)
}
  0x53   :  { %81 = dma.hbm_to_vmem [thread:$0]  %s1164_s7, 1024, %s76_s30, [#allocation9], %s960_s19, %s960_s19, %s961_s20  }
  0x54   :  { %951 = dma.done.wait [#allocation3], 128  }
  0x55   :  { %952 = vsyncadd [#allocation3], 4294967168 }
  0x56   :  { %953 = dma.done.wait [#allocation6], 2048  }
  0x57   :  { %954 = vsyncadd [#allocation6], 4294965248 }
  0x58   :  { %955 = dma.done.wait [#allocation9], 2048  }
  0x59   :  { %956 = vsyncadd [#allocation9], 4294965248  ;;  %v966_v0 = vmov 0.0   ;;  %vm967_vm0 = vmmov 0   ;;  %v779_v1 = vld [vmem:[#allocation5] sm:$0xff]   ;;  %v780_v2 = vld [vmem:[#allocation5 + $0x8] sm:$0xff]   ;;  %v558_v62 = vlaneseq }
  0x5a   :  { %689 = vmatprep.subr.bf16.mxu0 %v966_v0  ;;  %705 = vmatprep.mubr.msk.bf16.mxu0 %vm967_vm0, %v966_v0  ;;  %v781_v3 = vld [vmem:[#allocation5 + $0x10] sm:$0xff]   ;;  %v787_v4 = vld [vmem:[#allocation7] sm:$0xff]   ;;  %v782_v5 = vld [vmem:[#allocation5 + $0x18] sm:$0xff]  }
  0x5b   :  { %709 = vmatprep.subr.bf16.mxu1 %v966_v0  ;;  %725 = vmatprep.mubr.msk.bf16.mxu1 %vm967_vm0, %v966_v0  ;;  %v788_v6 = vld [vmem:[#allocation7 + $0x8] sm:$0xff]   ;;  %v783_v7 = vld [vmem:[#allocation5 + $0x20] sm:$0xff]   ;;  %v789_v8 = vld [vmem:[#allocation7 + $0x10] sm:$0xff]   ;;  %v559_v63 = vand.u32 127, %v558_v62 }
  0x5c   :  { %690 = vmatpush3.bf16.msra.mxu0 %v779_v1  ;;  %710 = vmatpush3.bf16.msra.mxu1 %v787_v4  ;;  %v784_v9 = vld [vmem:[#allocation5 + $0x28] sm:$0xff]   ;;  %v790_v10 = vld [vmem:[#allocation7 + $0x18] sm:$0xff]   ;;  %v785_v11 = vld [vmem:[#allocation5 + $0x30] sm:$0xff]  }
  0x5d   :  { %691 = vmatprep.subr.bf16.mxu0 %v966_v0  ;;  %711 = vmatprep.subr.bf16.mxu1 %v966_v0  ;;  %v791_v12 = vld [vmem:[#allocation7 + $0x20] sm:$0xff]   ;;  %v786_v13 = vld [vmem:[#allocation5 + $0x38] sm:$0xff]   ;;  %v792_v15 = vld [vmem:[#allocation7 + $0x28] sm:$0xff]   ;;  %vm560_vm4 = vcmp.lt.s32.totalorder %v559_v63, 8  ;;  %vm561_vm6 = vcmp.ge.s32.totalorder %v559_v63, 40  ;;  %vm562_vm7 = vcmp.lt.s32.totalorder %v559_v63, 72 }
  0x5e   :  { %v100_v14 = vld [vmem:[#allocation2] sm:$0xff]  ;;  %v793_v17 = vld [vmem:[#allocation7 + $0x30] sm:$0xff]   ;;  %v795_v19 = vld [vmem:[#allocation8] sm:$0xff]  }
  0x5f   :  { %v101_v16 = vpack.c.bf16 %v100_v14, %v100_v14  ;;  %v794_v18 = vld [vmem:[#allocation7 + $0x38] sm:$0xff]   ;;  %v796_v20 = vld [vmem:[#allocation8 + $0x8] sm:$0xff]   ;;  %v797_v21 = vld [vmem:[#allocation8 + $0x10] sm:$0xff]  }
  0x60   :  { %692 = vmatpush3.bf16.msra.mxu0 %v780_v2  ;;  %712 = vmatpush3.bf16.msra.mxu1 %v788_v6  ;;  %v798_v22 = vld [vmem:[#allocation8 + $0x18] sm:$0xff]   ;;  %v799_v23 = vld [vmem:[#allocation8 + $0x20] sm:$0xff]   ;;  %v800_v24 = vld [vmem:[#allocation8 + $0x28] sm:$0xff]  }
  0x61   :  { %693 = vmatprep.subr.bf16.mxu0 %v966_v0  ;;  %713 = vmatprep.subr.bf16.mxu1 %v966_v0  ;;  %v617_v25 = vld [vmem:[%s1159_s2] ss:$0 sm:$0xff]  ;;  %v801_v34 = vld [vmem:[#allocation8 + $0x30] sm:$0xff]   ;;  %v803_v36 = vld [vmem:[#allocation10] sm:$0xff]  }
  0x62   :  { %v802_v35 = vld [vmem:[#allocation8 + $0x38] sm:$0xff]   ;;  %v804_v37 = vld [vmem:[#allocation10 + $0x8] sm:$0xff]   ;;  %v805_v38 = vld [vmem:[#allocation10 + $0x10] sm:$0xff]  }
  0x63   :  { %v806_v39 = vld [vmem:[#allocation10 + $0x18] sm:$0xff]   ;;  %v807_v40 = vld [vmem:[#allocation10 + $0x20] sm:$0xff]   ;;  %v808_v41 = vld [vmem:[#allocation10 + $0x28] sm:$0xff]  }
  0x64   :  { %694 = vmatpush3.bf16.msra.mxu0 %v781_v3  ;;  %714 = vmatpush3.bf16.msra.mxu1 %v789_v8  ;;  %v626_v42 = vld [vmem:[%s1161_s4] ss:$0 sm:$0xff]  ;;  %v809_v51 = vld [vmem:[#allocation10 + $0x30] sm:$0xff]   ;;  %vm563_vm9 = vmand %vm561_vm6, %vm562_vm7 }
  0x65   :  { %695 = vmatprep.subr.bf16.mxu0 %v966_v0  ;;  %715 = vmatprep.subr.bf16.mxu1 %v966_v0  ;;  %v810_v52 = vld [vmem:[#allocation10 + $0x38] sm:$0xff]  }
  0x66   :  { %v635_v53 = vld [vmem:[%s1163_s6] ss:$0 sm:$0xff]  ;;  %s968_s6 = smov [#allocation11]  }
  0x68   :  { %696 = vmatpush3.bf16.msra.mxu0 %v782_v5  ;;  %716 = vmatpush3.bf16.msra.mxu1 %v790_v10 }
  0x69   :  { %697 = vmatprep.subr.bf16.mxu0 %v966_v0  ;;  %717 = vmatprep.subr.bf16.mxu1 %v966_v0 }
  0x6c   :  { %698 = vmatpush3.bf16.msra.mxu0 %v783_v7  ;;  %718 = vmatpush3.bf16.msra.mxu1 %v791_v12 }
  0x6d   :  { %699 = vmatprep.subr.bf16.mxu0 %v966_v0  ;;  %719 = vmatprep.subr.bf16.mxu1 %v966_v0 }
  0x70   :  { %700 = vmatpush3.bf16.msra.mxu0 %v784_v9  ;;  %720 = vmatpush3.bf16.msra.mxu1 %v792_v15 }
  0x71   :  { %701 = vmatprep.subr.bf16.mxu0 %v966_v0  ;;  %721 = vmatprep.subr.bf16.mxu1 %v966_v0 }
  0x74   :  { %702 = vmatpush3.bf16.msra.mxu0 %v785_v11  ;;  %722 = vmatpush3.bf16.msra.mxu1 %v793_v17 }
  0x75   :  { %703 = vmatprep.subr.bf16.mxu0 %v966_v0  ;;  %723 = vmatprep.subr.bf16.mxu1 %v966_v0 }
  0x78   :  { %704 = vmatpush3.bf16.msra.mxu0 %v786_v13  ;;  %724 = vmatpush3.bf16.msra.mxu1 %v794_v18 }
  0x79   :  { %729 = vmatprep.subr.bf16.mxu0 %v966_v0  ;;  %749 = vmatprep.subr.bf16.mxu1 %v966_v0 }
  0x7b   :  { %706 = vmatmul.mubr.bf16.vlgmr.msra.gmra.mrb[0].mxu0 %v101_v16 }
  0x7c   :  { %745 = vmatprep.mubr.msk.bf16.mxu0 %vm967_vm0, %v966_v0  ;;  %730 = vmatpush3.bf16.msra.mxu0 %v795_v19 }
  0x7d   :  { %731 = vmatprep.subr.bf16.mxu0 %v966_v0 }
  0x80   :  { %732 = vmatpush3.bf16.msra.mxu0 %v796_v20 }
  0x81   :  { %733 = vmatprep.subr.bf16.mxu0 %v966_v0 }
  0x84   :  { %734 = vmatpush3.bf16.msra.mxu0 %v797_v21 }
  0x85   :  { %735 = vmatprep.subr.bf16.mxu0 %v966_v0 }
  0x88   :  { %736 = vmatpush3.bf16.msra.mxu0 %v798_v22 }
  0x89   :  { %737 = vmatprep.subr.bf16.mxu0 %v966_v0 }
  0x8c   :  { %738 = vmatpush3.bf16.msra.mxu0 %v799_v23 }
  0x8d   :  { %739 = vmatprep.subr.bf16.mxu0 %v966_v0 }
  0x90   :  { %740 = vmatpush3.bf16.msra.mxu0 %v800_v24 }
  0x91   :  { %741 = vmatprep.subr.bf16.mxu0 %v966_v0 }
  0x94   :  { %742 = vmatpush3.bf16.msra.mxu0 %v801_v34 }
  0x95   :  { %743 = vmatprep.subr.bf16.mxu0 %v966_v0 }
  0x98   :  { %744 = vmatpush3.bf16.msra.mxu0 %v802_v35 }
 0x14e   :  { %v207_v26 = vpop.f32.mrb[0].mxu0 }
 0x14f   :  { %v208_v27 = vadd.f32 %v617_v25, %v207_v26  ;;  %v707_v28 = vpop.f32.mrb[1].mxu0 }
 0x150   :  { %v210_v29 = vpop.f32.mrb[2].mxu0 }
 0x151   :  { %vm213_vm1 = vcmp.gt.f32.partialorder %v208_v27, 0.0  ;;  %v214_v30 = vmul.f32 0.2, %v208_v27  ;;  %v708_v31 = vpop.f32.mrb[3].mxu0 }
 0x153   :  { %v215_v32 = vsel %vm213_vm1, %v208_v27, %v214_v30 }
 0x154   :  { %v216_v33 = vpack.c.bf16 %v215_v32, %v215_v32 }
 0x156   :  { %726 = vmatmul.mubr.bf16.vlgmr.msra.gmra.mrb[0].mxu1 %v216_v33 }
 0x157   :  { %765 = vmatprep.mubr.msk.bf16.mxu1 %vm967_vm0, %v966_v0  ;;  %750 = vmatpush3.bf16.msra.mxu1 %v803_v36 }
 0x158   :  { %751 = vmatprep.subr.bf16.mxu1 %v966_v0 }
 0x15b   :  { %752 = vmatpush3.bf16.msra.mxu1 %v804_v37 }
 0x15c   :  { %753 = vmatprep.subr.bf16.mxu1 %v966_v0 }
 0x15f   :  { %754 = vmatpush3.bf16.msra.mxu1 %v805_v38 }
 0x160   :  { %755 = vmatprep.subr.bf16.mxu1 %v966_v0 }
 0x163   :  { %756 = vmatpush3.bf16.msra.mxu1 %v806_v39 }
 0x164   :  { %757 = vmatprep.subr.bf16.mxu1 %v966_v0 }
 0x167   :  { %758 = vmatpush3.bf16.msra.mxu1 %v807_v40 }
 0x168   :  { %759 = vmatprep.subr.bf16.mxu1 %v966_v0 }
 0x16b   :  { %760 = vmatpush3.bf16.msra.mxu1 %v808_v41 }
 0x16c   :  { %761 = vmatprep.subr.bf16.mxu1 %v966_v0 }
 0x16f   :  { %762 = vmatpush3.bf16.msra.mxu1 %v809_v51 }
 0x170   :  { %763 = vmatprep.subr.bf16.mxu1 %v966_v0  ;;  %v644_v0 = vld [vmem:[%s1165_s8] ss:$0 sm:$0xff]  ;;  %s606_s8 = sshll.u32 %s968_s6, 4  ;;  %s607_s8 = int_to_ptr.vmem [resolvable:$true] %s606_s8 }
 0x171   :  { %s929_s11 = scalar_lea.vmem %s607_s8, 128  ;;  %p934_p13 = scmp.lt.s32.totalorder %s607_s8, %s607_s8 }
 0x172   :  { %p930_p12 = scmp.ne.s32.totalorder %s607_s8, %s929_s11  ;;  %p935_p0 = scmp.lt.s32.totalorder %s929_s11, %s929_s11 }
 0x173   :  { %764 = vmatpush3.bf16.msra.mxu1 %v810_v52 }
 0x174   :  { %p936_p1 = por %p935_p0, %p934_p13 }
 0x176   :  { %p937_p2 = pnand %p936_p1, %p930_p12 }
 0x229   :  { %v322_v43 = vpop.f32.mrb[0].mxu1 }
 0x22a   :  { %v323_v44 = vadd.f32 %v626_v42, %v322_v43  ;;  %v727_v45 = vpop.f32.mrb[1].mxu1 }
 0x22b   :  { %v325_v46 = vpop.f32.mrb[2].mxu1 }
 0x22c   :  { %vm328_vm2 = vcmp.gt.f32.partialorder %v323_v44, 0.0  ;;  %v329_v47 = vmul.f32 0.2, %v323_v44  ;;  %v728_v48 = vpop.f32.mrb[3].mxu1 }
 0x22e   :  { %v330_v49 = vsel %vm328_vm2, %v323_v44, %v329_v47 }
 0x22f   :  { %v331_v50 = vpack.c.bf16 %v330_v49, %v330_v49 }
 0x231   :  { %746 = vmatmul.mubr.bf16.vlgmr.msra.gmra.mrb[4].mxu0 %v331_v50 }
 0x304   :  { %v437_v54 = vpop.f32.mrb[4].mxu0 }
 0x305   :  { %v438_v55 = vadd.f32 %v635_v53, %v437_v54  ;;  %v747_v56 = vpop.f32.mrb[5].mxu0 }
 0x306   :  { %v440_v57 = vpop.f32.mrb[6].mxu0 }
 0x307   :  { %vm443_vm3 = vcmp.gt.f32.partialorder %v438_v55, 0.0  ;;  %v444_v58 = vmul.f32 0.2, %v438_v55  ;;  %v748_v59 = vpop.f32.mrb[7].mxu0 }
 0x309   :  { %v445_v60 = vsel %vm443_vm3, %v438_v55, %v444_v58 }
 0x30a   :  { %v446_v61 = vpack.c.bf16 %v445_v60, %v445_v60 }
 0x30c   :  { %766 = vmatmul.mubr.bf16.vlgmr.msra.gmra.mrb[4].mxu1 %v446_v61 }
 0x3df   :  { %v552_v1 = vpop.f32.mrb[4].mxu1 }
 0x3e0   :  { %v553_v2 = vadd.f32 %v644_v0, %v552_v1  ;;  %v767_v3 = vpop.f32.mrb[5].mxu1 }
 0x3e1   :  { %v555_v4 = vpop.f32.mrb[6].mxu1 }
 0x3e2   :  { %v579_v5 = vand.u32 2147483647, %v553_v2  ;;  %v768_v6 = vpop.f32.mrb[7].mxu1  ;;  %v566_v7 = vsel %vm560_vm4, %v553_v2, -inf  ;;  %v576_v18 = vmax.f32 %v553_v2, 0.0  ;;  %vm577_vm8 = vcmp.ne.f32.partialorder %v553_v2, %v553_v2 }
 0x3e3   :  { %567 = vmax.xlane.f32.xlu0 %v566_v7 }
 0x3e4   :  { %v580_v8 = vsub.f32 0.0, %v579_v5 }
 0x3e6   :  { %v581_v9 = vmul.f32 1.442695, %v580_v8 }
 0x3e8   :  { %811 = vpow2.f32 %v581_v9 }
 0x3f2   :  { %v812_v10 = vpop.eup %811 }
 0x3f3   :  { %v583_v11 = vadd.f32 1.0, %v812_v10  ;;  %v586_v12 = vmul.f32 -0.5, %v812_v10  ;;  %v589_v14 = vand.u32 2147483647, %v812_v10 }
 0x3f5   :  { %813 = vlog2.f32 %v583_v11  ;;  %v587_v13 = vadd.f32 1.0, %v586_v12  ;;  %vm590_vm5 = vcmp.lt.f32.partialorder %v589_v14, 0.0004427343 }
 0x3f7   :  { %v588_v17 = vmul.f32 %v812_v10, %v587_v13 }
 0x3ff   :  { %v814_v15 = vpop.eup %813 }
 0x400   :  { %v585_v16 = vmul.f32 0.6931472, %v814_v15 }
 0x402   :  { %v591_v19 = vsel %vm590_vm5, %v588_v17, %v585_v16 }
 0x403   :  { %v592_v20 = vadd.f32 %v591_v19, %v576_v18 }
 0x405   :  { %v593_v21 = vsel %vm577_vm8, %v553_v2, %v592_v20 }
 0x406   :  { %v594_v22 = vmax.f32 %v593_v21, 0.001 }
 0x408   :  { %v597_v23 = vsel %vm563_vm9, %v594_v22, %v553_v2 }
 0x470   :  { %v568_v24 = vpop.xlane.xlu0 %567 }
 0x471   :  { %v569_v25 = vsub.f32 %v566_v7, %v568_v24 }
 0x473   :  { %v570_v26 = vmul.f32 1.442695, %v569_v25 }
 0x475   :  { %815 = vpow2.f32 %v570_v26 }
 0x47f   :  { %v816_v27 = vpop.eup %815 }
 0x480   :  { %572 = vadd.xlane.f32.xlu0 %v816_v27 }
 0x50d   :  { %v573_v28 = vpop.xlane.xlu0 %572 }
 0x50e   :  { %817 = vrcp.f32 %v573_v28 }
 0x518   :  { %v818_v29 = vpop.eup %817 }
 0x519   :  { %v575_v30 = vmul.f32 %v818_v29, %v816_v27 }
 0x51b   :  { %v598_v31 = vsel %vm560_vm4, %v575_v30, %v597_v23 }
 0x51c   :  { %599 = vst [vmem:[#allocation11] sm:$0xff] %v598_v31 }
 0x51d   :  { %940 = shalt.err (!%p937_p2)
}
 0x51e   :  { %s941_s1 = scalar_lea.hbm %s1166_s9, 128 }
 0x51f   :  { %p942_p3 = scmp.ne.s32.totalorder %s1166_s9, %s941_s1  ;;  %p945_p4 = scmp.lt.u32.totalorder %s941_s1, %s1166_s9 }
 0x521   :  { %p947_p5 = pnand %p945_p4, %p942_p3 }
 0x523   :  { %950 = shalt.err (!%p947_p5)
}
 0x524   :  { %609 = dma.vmem_to_hbm [thread:$0]  %s607_s8, 128, %s1166_s9, [#allocation4]  }
 0x525   :  { %957 = dma.done.wait [#allocation4], 128  }
 0x526   :  { %958 = vsyncadd [#allocation4], 4294967168 }
 0x527   :  { %613 = vsyncpa [#allocation3], 1 }
 0x528   :  { %614 = vsyncpa [#allocation6], 1 }
 0x529   :  { %615 = vsyncpa [#allocation9], 1 }
 0x52a   :  { %616 = vsyncpa [#allocation4], 1 }

</bundles_post_ra>
